<compile_context>
chip_gen: v6e
topology: v6e:2x2x1
jax: 0.10.0
libtpu: 0.0.40
codegen_flags: <defaults>
</compile_context>

<pallas_src>
import jax
import jax.numpy as jnp
from jax.experimental import pallas as pl
from jax.experimental.pallas import tpu as pltpu

BN_EPS = 1e-5
LANE = 128


# ---------------------------------------------------------------------------
# Kernel
# ---------------------------------------------------------------------------
def _bn_relu_to_bf16(h, inv_b):
    """Training-mode BN (biased var, identity affine) + ReLU, emitted as bf16 for the next MXU pass."""
    mu = jnp.sum(h, axis=0, keepdims=True) * inv_b
    d = h - mu
    var = jnp.sum(d * d, axis=0, keepdims=True) * inv_b      # centered: no cancellation
    s = jax.lax.rsqrt(var + BN_EPS)
    return jnp.maximum(d * s, 0.0).astype(jnp.bfloat16)


def actor_kernel(x_ref, w1_ref, w2_ref, w3_ref, b3_ref, o_ref):
    # x: [B, S] f32 ; w1: [S, H1] bf16 ; w2: [H1, H2] bf16 ; w3: [H2, A_pad] bf16
    # b3: [1, A_pad] f32 ; o: [B, A_pad] f32
    inv_b = 1.0 / x_ref.shape[0]                              # static python float

    x = x_ref[...].astype(jnp.bfloat16)

    # dense1 (no bias) -> BN -> ReLU (folded, bf16 epilogue)
    h1 = jnp.dot(x, w1_ref[...], preferred_element_type=jnp.float32)
    h1 = _bn_relu_to_bf16(h1, inv_b)

    # dense2 (no bias) -> BN -> ReLU
    h2 = jnp.dot(h1, w2_ref[...], preferred_element_type=jnp.float32)
    h2 = _bn_relu_to_bf16(h2, inv_b)

    # dense3 (+bias) -> tanh, lane-dense padded output (tanh(0)=0 in pad lanes)
    out = jnp.dot(h2, w3_ref[...], preferred_element_type=jnp.float32)
    o_ref[...] = jnp.tanh(out + b3_ref[...]).astype(o_ref.dtype)


# ---------------------------------------------------------------------------
# One-time parameter packing (hoisted out of the per-call path)
# ---------------------------------------------------------------------------
def pack_actor_params(w1, w2, w3, b3):
    """PyTorch layout -> kernel layout.  Call once; reuse across forward calls.

    w1: [size1, state_size], w2: [size2, size1], w3: [action_size, size2], b3: [action_size].
    """
    H2, A = w3.shape[1], w3.shape[0]
    A_pad = max(LANE, ((A + LANE - 1) // LANE) * LANE)
    w1t = jnp.asarray(w1.T, jnp.bfloat16)                                    # [S,  H1]
    w2t = jnp.asarray(w2.T, jnp.bfloat16)                                    # [H1, H2]
    w3t = jnp.zeros((H2, A_pad), jnp.bfloat16).at[:, :A].set(
        jnp.asarray(w3.T, jnp.bfloat16))                                     # [H2, A_pad]
    b3p = jnp.zeros((1, A_pad), jnp.float32).at[:, :A].set(
        jnp.asarray(b3, jnp.float32).reshape(1, A))                          # [1,  A_pad]
    return (w1t, w2t, w3t, b3p)


# ---------------------------------------------------------------------------
# Forward wrappers
# ---------------------------------------------------------------------------
def _actor_call(xg, w1t, w2t, w3t, b3p):
    """xg: [T, B, S] f32 -> [T, B, A_pad] f32.  One grid step per BN group."""
    T, B, S = xg.shape
    H1, H2 = w1t.shape[1], w2t.shape[1]
    A_pad = w3t.shape[1]
    return pl.pallas_call(
        actor_kernel,
        out_shape=jax.ShapeDtypeStruct((T, B, A_pad), jnp.float32),
        grid=(T,),
        in_specs=[
            pl.BlockSpec((None, B, S), lambda t: (t, 0, 0)),      # per-group activations
            pl.BlockSpec((S, H1), lambda t: (0, 0)),              # weights stay VMEM-resident
            pl.BlockSpec((H1, H2), lambda t: (0, 0)),
            pl.BlockSpec((H2, A_pad), lambda t: (0, 0)),
            pl.BlockSpec((1, A_pad), lambda t: (0, 0)),
        ],
        out_specs=pl.BlockSpec((None, B, A_pad), lambda t: (t, 0, 0)),
        compiler_params=pltpu.CompilerParams(
            dimension_semantics=("parallel",),                    # megacore on v7x
        ),
    )(xg, w1t, w2t, w3t, b3p)


def actor_forward_grouped(xg, packed, action_size):
    """xg: [T, B, state_size]; each [B, state_size] group is an independent module forward."""
    out = _actor_call(jnp.asarray(xg, jnp.float32), *packed)
    return out[..., :action_size]     # consumers that accept the 128-lane padded output can skip this


def actor_forward(x, packed, action_size):
    """x: [B, state_size] -> [B, action_size]; semantics of Actor.forward (train-mode BN)."""
    return actor_forward_grouped(x[None], packed, action_size)[0]


# ---------------------------------------------------------------------------
# Parameter init (mirrors the PyTorch reset_parameters)
# ---------------------------------------------------------------------------
def init_actor_params(key, state_size, action_size, size1=256, size2=128):
    k1, k2, k3, k4 = jax.random.split(key, 4)
    # hidden_init uses weight.size()[0] == out_features as "fan_in".
    lim1 = 1.0 / jnp.sqrt(jnp.float32(size1))
    lim2 = 1.0 / jnp.sqrt(jnp.float32(size2))
    w1 = jax.random.uniform(k1, (size1, state_size), jnp.float32, -lim1, lim1)
    w2 = jax.random.uniform(k2, (size2, size1), jnp.float32, -lim2, lim2)
    w3 = jax.random.uniform(k3, (action_size, size2), jnp.float32, -0.003, 0.003)
    b3 = jax.random.uniform(k4, (action_size,), jnp.float32, -0.003, 0.003)
    return w1, w2, w3, b3


# ---------------------------------------------------------------------------
# Pure-JAX references
# ---------------------------------------------------------------------------
def _bn_relu_ref(h):
    mu = h.mean(0, keepdims=True)
    d = h - mu
    var = (d * d).mean(0, keepdims=True)
    return jnp.maximum(d * jax.lax.rsqrt(var + BN_EPS), 0.0)


def actor_reference_mixed(x, w1, w2, w3, b3):
    """Mirrors the kernel math exactly (bf16 MXU operands, f32 accum, centered BN)."""
    def mm(a, b):
        return jax.lax.dot(a.astype(jnp.bfloat16), b.astype(jnp.bfloat16),
                           preferred_element_type=jnp.float32)
    h1 = _bn_relu_ref(mm(x, w1.T))
    h2 = _bn_relu_ref(mm(h1, w2.T))
    return jnp.tanh(mm(h2, w3.T) + b3.reshape(1, -1))


def actor_reference_f32(x, w1, w2, w3, b3):
    """Full-precision reference of the original module's forward pass."""
    h1 = _bn_relu_ref(x @ w1.T)
    h2 = _bn_relu_ref(h1 @ w2.T)
    return jnp.tanh(h2 @ w3.T + b3.reshape(1, -1))


# ---------------------------------------------------------------------------
if __name__ == "__main__":
    key = jax.random.PRNGKey(0)
    kx, kp = jax.random.split(key)

    batch = 8          # one BN group == the module's forward batch
    groups = 4         # independent forward batches amortized over one kernel launch
    state_size = 32
    action_size = 4

    w1, w2, w3, b3 = init_actor_params(kp, state_size, action_size)
    packed = pack_actor_params(w1, w2, w3, b3)     # one-time packing; reused every call

    xg = jax.random.normal(kx, (groups, batch, state_size), jnp.float32)

    fwd_grouped = jax.jit(actor_forward_grouped, static_argnums=(2,))
    out = jax.block_until_ready(fwd_grouped(xg, packed, action_size))

    ref_mixed = jax.vmap(lambda xb: actor_reference_mixed(xb, w1, w2, w3, b3))(xg)
    ref_f32 = jax.vmap(lambda xb: actor_reference_f32(xb, w1, w2, w3, b3))(xg)

    assert out.shape == (groups, batch, action_size)
    assert jnp.allclose(out, ref_mixed, atol=1e-3), float(jnp.max(jnp.abs(out - ref_mixed)))
    assert jnp.allclose(out, ref_f32, atol=5e-3), float(jnp.max(jnp.abs(out - ref_f32)))

    # single-batch (T=1) path == the module's forward on one batch
    fwd_single = jax.jit(actor_forward, static_argnums=(2,))
    out1 = jax.block_until_ready(fwd_single(xg[0], packed, action_size))
    assert out1.shape == (batch, action_size)
    assert jnp.allclose(out1, out[0], atol=1e-5)

    print("KERNEL_OK")
</pallas_src>

<mosaic_0001>
module attributes {stable_mosaic.version = 11 : i64} {
  func.func @actor_kernel(%arg0: i32, %arg1: memref<1x8x32xf32, #tpu.memory_space<vmem>>, %arg2: memref<32x256xbf16, #tpu.memory_space<vmem>>, %arg3: memref<256x128xbf16, #tpu.memory_space<vmem>>, %arg4: memref<128x128xbf16, #tpu.memory_space<vmem>>, %arg5: memref<1x128xf32, #tpu.memory_space<vmem>>, %arg6: memref<1x8x128xf32, #tpu.memory_space<vmem>>) attributes {dimension_semantics = [#tpu.dimension_semantics<parallel>], iteration_bounds = array<i64: 4>, scalar_prefetch = 0 : i64, scratch_operands = 0 : i64, tpu.core_type = #tpu.core_type<tc>, window_params = [{transform_indices = @transform_0, window_bounds = array<i64: 1, 8, 32>}, {pipeline_mode = #tpu.pipeline_mode<synchronous>, transform_indices = @transform_1, window_bounds = array<i64: 32, 256>}, {pipeline_mode = #tpu.pipeline_mode<synchronous>, transform_indices = @transform_2, window_bounds = array<i64: 256, 128>}, {pipeline_mode = #tpu.pipeline_mode<synchronous>, transform_indices = @transform_3, window_bounds = array<i64: 128, 128>}, {pipeline_mode = #tpu.pipeline_mode<synchronous>, transform_indices = @transform_4, window_bounds = array<i64: 1, 128>}, {transform_indices = @transform_5, window_bounds = array<i64: 1, 8, 128>}]} {
    %c0 = arith.constant 0 : index
    %c0_0 = arith.constant 0 : index
    %c0_1 = arith.constant 0 : index
    %0 = vector.load %arg1[%c0, %c0_0, %c0_1] : memref<1x8x32xf32, #tpu.memory_space<vmem>>, vector<1x8x32xf32>
    %1 = vector.shape_cast %0 : vector<1x8x32xf32> to vector<8x32xf32>
    %2 = arith.truncf %1 : vector<8x32xf32> to vector<8x32xbf16>
    %c0_2 = arith.constant 0 : index
    %c0_3 = arith.constant 0 : index
    %3 = vector.load %arg2[%c0_2, %c0_3] : memref<32x256xbf16, #tpu.memory_space<vmem>>, vector<32x256xbf16>
    %cst = arith.constant dense<0.000000e+00> : vector<8x256xf32>
    %4 = tpu.matmul %2, %3, %cst {dimension_numbers = #tpu.dot_dimension_numbers<[1], [0], [0], [1], [0, 0, 1, 1], [], []>} : vector<8x32xbf16>, vector<32x256xbf16>, vector<8x256xf32> -> vector<8x256xf32>
    %cst_4 = arith.constant dense<0.000000e+00> : vector<256xf32>
    %5 = vector.multi_reduction <add>, %4, %cst_4 [0] : vector<8x256xf32> to vector<256xf32>
    %6 = vector.shape_cast %5 : vector<256xf32> to vector<1x256xf32>
    %cst_5 = arith.constant 1.250000e-01 : f32
    %7 = vector.broadcast %cst_5 : f32 to vector<1x256xf32>
    %8 = arith.mulf %6, %7 : vector<1x256xf32>
    %9 = vector.broadcast %8 : vector<1x256xf32> to vector<8x256xf32>
    %10 = arith.subf %4, %9 : vector<8x256xf32>
    %11 = arith.mulf %10, %10 : vector<8x256xf32>
    %cst_6 = arith.constant dense<0.000000e+00> : vector<256xf32>
    %12 = vector.multi_reduction <add>, %11, %cst_6 [0] : vector<8x256xf32> to vector<256xf32>
    %13 = vector.shape_cast %12 : vector<256xf32> to vector<1x256xf32>
    %cst_7 = arith.constant 1.250000e-01 : f32
    %14 = vector.broadcast %cst_7 : f32 to vector<1x256xf32>
    %15 = arith.mulf %13, %14 : vector<1x256xf32>
    %cst_8 = arith.constant 9.99999974E-6 : f32
    %16 = vector.broadcast %cst_8 : f32 to vector<1x256xf32>
    %17 = arith.addf %15, %16 : vector<1x256xf32>
    %18 = math.rsqrt %17 : vector<1x256xf32>
    %19 = vector.broadcast %18 : vector<1x256xf32> to vector<8x256xf32>
    %20 = arith.mulf %10, %19 : vector<8x256xf32>
    %cst_9 = arith.constant 0.000000e+00 : f32
    %21 = vector.broadcast %cst_9 : f32 to vector<8x256xf32>
    %22 = arith.maximumf %20, %21 : vector<8x256xf32>
    %23 = arith.truncf %22 : vector<8x256xf32> to vector<8x256xbf16>
    %c0_10 = arith.constant 0 : index
    %c0_11 = arith.constant 0 : index
    %24 = vector.load %arg3[%c0_10, %c0_11] : memref<256x128xbf16, #tpu.memory_space<vmem>>, vector<256x128xbf16>
    %cst_12 = arith.constant dense<0.000000e+00> : vector<8x128xf32>
    %25 = tpu.matmul %23, %24, %cst_12 {dimension_numbers = #tpu.dot_dimension_numbers<[1], [0], [0], [1], [0, 0, 1, 1], [], []>} : vector<8x256xbf16>, vector<256x128xbf16>, vector<8x128xf32> -> vector<8x128xf32>
    %cst_13 = arith.constant dense<0.000000e+00> : vector<128xf32>
    %26 = vector.multi_reduction <add>, %25, %cst_13 [0] : vector<8x128xf32> to vector<128xf32>
    %27 = vector.shape_cast %26 : vector<128xf32> to vector<1x128xf32>
    %cst_14 = arith.constant 1.250000e-01 : f32
    %28 = vector.broadcast %cst_14 : f32 to vector<1x128xf32>
    %29 = arith.mulf %27, %28 : vector<1x128xf32>
    %30 = vector.broadcast %29 : vector<1x128xf32> to vector<8x128xf32>
    %31 = arith.subf %25, %30 : vector<8x128xf32>
    %32 = arith.mulf %31, %31 : vector<8x128xf32>
    %cst_15 = arith.constant dense<0.000000e+00> : vector<128xf32>
    %33 = vector.multi_reduction <add>, %32, %cst_15 [0] : vector<8x128xf32> to vector<128xf32>
    %34 = vector.shape_cast %33 : vector<128xf32> to vector<1x128xf32>
    %cst_16 = arith.constant 1.250000e-01 : f32
    %35 = vector.broadcast %cst_16 : f32 to vector<1x128xf32>
    %36 = arith.mulf %34, %35 : vector<1x128xf32>
    %cst_17 = arith.constant 9.99999974E-6 : f32
    %37 = vector.broadcast %cst_17 : f32 to vector<1x128xf32>
    %38 = arith.addf %36, %37 : vector<1x128xf32>
    %39 = math.rsqrt %38 : vector<1x128xf32>
    %40 = vector.broadcast %39 : vector<1x128xf32> to vector<8x128xf32>
    %41 = arith.mulf %31, %40 : vector<8x128xf32>
    %cst_18 = arith.constant 0.000000e+00 : f32
    %42 = vector.broadcast %cst_18 : f32 to vector<8x128xf32>
    %43 = arith.maximumf %41, %42 : vector<8x128xf32>
    %44 = arith.truncf %43 : vector<8x128xf32> to vector<8x128xbf16>
    %c0_19 = arith.constant 0 : index
    %c0_20 = arith.constant 0 : index
    %45 = vector.load %arg4[%c0_19, %c0_20] : memref<128x128xbf16, #tpu.memory_space<vmem>>, vector<128x128xbf16>
    %cst_21 = arith.constant dense<0.000000e+00> : vector<8x128xf32>
    %46 = tpu.matmul %44, %45, %cst_21 {dimension_numbers = #tpu.dot_dimension_numbers<[1], [0], [0], [1], [0, 0, 1, 1], [], []>} : vector<8x128xbf16>, vector<128x128xbf16>, vector<8x128xf32> -> vector<8x128xf32>
    %c0_22 = arith.constant 0 : index
    %c0_23 = arith.constant 0 : index
    %47 = vector.load %arg5[%c0_22, %c0_23] : memref<1x128xf32, #tpu.memory_space<vmem>>, vector<1x128xf32>
    %48 = vector.broadcast %47 : vector<1x128xf32> to vector<8x128xf32>
    %49 = arith.addf %46, %48 : vector<8x128xf32>
    %50 = math.tanh %49 : vector<8x128xf32>
    %c0_24 = arith.constant 0 : index
    %c0_25 = arith.constant 0 : index
    %c0_26 = arith.constant 0 : index
    %51 = vector.load %arg6[%c0_24, %c0_25, %c0_26] : memref<1x8x128xf32, #tpu.memory_space<vmem>>, vector<1x8x128xf32>
    %52 = vector.shape_cast %51 : vector<1x8x128xf32> to vector<8x128xf32>
    %53 = vector.shape_cast %50 : vector<8x128xf32> to vector<1x8x128xf32>
    tpu.vector_store %arg6[%c0_24, %c0_25, %c0_26], %53 {strides = array<i32>} : memref<1x8x128xf32, #tpu.memory_space<vmem>>, vector<1x8x128xf32>,
    return
  }
  func.func @transform_0(%arg0: i32) -> (i32, i32, i32) {
    %c0_i32 = arith.constant 0 : i32
    %c0_i32_0 = arith.constant 0 : i32
    %c0_i32_1 = arith.constant 0 : i32
    return %arg0, %c0_i32, %c0_i32_0 : i32, i32, i32
  }
  func.func @transform_1(%arg0: i32) -> (i32, i32) {
    %c0_i32 = arith.constant 0 : i32
    %c0_i32_0 = arith.constant 0 : i32
    %c0_i32_1 = arith.constant 0 : i32
    return %c0_i32, %c0_i32_0 : i32, i32
  }
  func.func @transform_2(%arg0: i32) -> (i32, i32) {
    %c0_i32 = arith.constant 0 : i32
    %c0_i32_0 = arith.constant 0 : i32
    %c0_i32_1 = arith.constant 0 : i32
    return %c0_i32, %c0_i32_0 : i32, i32
  }
  func.func @transform_3(%arg0: i32) -> (i32, i32) {
    %c0_i32 = arith.constant 0 : i32
    %c0_i32_0 = arith.constant 0 : i32
    %c0_i32_1 = arith.constant 0 : i32
    return %c0_i32, %c0_i32_0 : i32, i32
  }
  func.func @transform_4(%arg0: i32) -> (i32, i32) {
    %c0_i32 = arith.constant 0 : i32
    %c0_i32_0 = arith.constant 0 : i32
    %c0_i32_1 = arith.constant 0 : i32
    return %c0_i32, %c0_i32_0 : i32, i32
  }
  func.func @transform_5(%arg0: i32) -> (i32, i32, i32) {
    %c0_i32 = arith.constant 0 : i32
    %c0_i32_0 = arith.constant 0 : i32
    %c0_i32_1 = arith.constant 0 : i32
    return %arg0, %c0_i32, %c0_i32_0 : i32, i32, i32
  }
}

</mosaic_0001>

<bundles_post_ra>
// kernel: actor_forward_grouped.1
= control target key start
LH: loop header
LB: loop body
LE: loop exit
PB: predicated region body
PF: predicated region fallthrough
CT: control target
= control target key end

     0   :  { %10 = vsyncpa [#allocation3], 0  ;;  %s1340_s0 = inlined_call_operand.hbm [shape: f32[4,8,32], index: 0, kind: input, shape index: {}]   ;;  %s1341_s1 = inlined_call_operand.hbm [shape: bf16[32,256], index: 1, kind: input, shape index: {}]   ;;  %s1342_s2 = inlined_call_operand.hbm [shape: bf16[256,128], index: 2, kind: input, shape index: {}]   ;;  %s1343_s3 = inlined_call_operand.hbm [shape: bf16[128,128], index: 3, kind: input, shape index: {}]   ;;  %s1344_s4 = inlined_call_operand.vmem [shape: f32[1,128], index: 4, kind: input, shape index: {}]   ;;  %s1345_s5 = inlined_call_operand.vmem [shape: f32[4,8,128], index: 5, kind: output, shape index: {}]  }
   0x1   :  { %12 = vsyncpa [#allocation3 + $0x1], 0 }
   0x2   :  { %13 = vsyncpa [#allocation5], 0 }
   0x3   :  { %14 = vsyncpa [#allocation8], 0  ;;  %s1197_s18 = smov 0   ;;  %s1199_s19 = smov 0  }
   0x4   :  { %s1201_s20 = smov 0   ;;  %s1203_s21 = smov 0  }
   0x5 LB: > { %s1216_s22 = sadd.s32 4294967295, %s1154_s21   ;;  %p40_p0 = scmp.ne.s32.totalorder %s1146_s19, %s1142_s18  ;;  %s1154_s21 = sphi %s1203_s21, %s1362_s21   ;;  %s1150_s20 = sphi %s1201_s20, %s1361_s20   ;;  %s1146_s19 = sphi %s1199_s19, %s1360_s19   ;;  %s1142_s18 = sphi %s1197_s18, %s1359_s18  }
   0x6   : > { %p1346_p1 = scmp.eq.s32.totalorder %s1216_s22, 0  ;;  %p795_p2 = scmp.ge.s32.totalorder %s1154_s21, 1 }
   0x7   : > { %p161_p3 = scmp.lt.s32.totalorder %s1154_s21, 5  ;;  %s1156_s25 = smov [#allocation4]  }
   0x8   : > { %p1224_p4 = por %p1346_p1, %p40_p0  ;;  %s173_s26 = sshll.u32 %s1156_s25, 4  ;;  %s174_s26 = int_to_ptr.vmem [resolvable:$true] %s173_s26 }
   0x9   : > { %p1228_p5 = pnand %p795_p2, %p161_p3  ;;  %s1157_s28 = smov [#allocation6]  }
   0xa   : > { %s1349_s23 = scalar_select %p1224_p4, 1, 0 }
   0xb   : > { %s1350_s24 = scalar_select %p1228_p5, 1, 0 }
   0xc   : > { %p905_p6 = pneg %p1228_p5  ;;  %s186_s29 = sshll.u32 %s1157_s28, 4  ;;  %s187_s29 = int_to_ptr.vmem [resolvable:$true] %s186_s29 }
   0xd   : > { %s1017_s30 = scalar_lea.vmem %s174_s26, 512  ;;  %p1025_p12 = scmp.lt.s32.totalorder %s174_s26, %s174_s26 }
   0xe   : > { %p1236_p7 = pnand %p905_p6, %p1346_p1  ;;  %p1018_p9 = scmp.ne.s32.totalorder %s174_s26, %s1017_s30 }
   0xf   : > { %p1026_p13 = scmp.lt.s32.totalorder %s1017_s30, %s1017_s30 }
  0x10   : > { %p1008_p8 = pneg %p1236_p7 }
  0x11   : > { %p1027_p0 = por %p1026_p13, %p1025_p12 }
  0x12   : > { %p1020_p10 = pnand %p1018_p9, %p1008_p8 }
  0x14   : > { %p1021_p11 = pneg %p1020_p10 }
  0x16   : > { %p1028_p2 = pnand %p1027_p0, %p1021_p11 }
  0x18   : > { %1031 = shalt.err (!%p1028_p2)
}
  0x19   : > { %s1158_s6 = smov 128   ;;  %s1159_s7 = smov 8  }
  0x1a   : > { %908 = dma.hbm_to_vmem [thread:$0]  (!%p1236_p7), %s1341_s1, 512, %s174_s26, [#allocation5], %s1158_s6, %s1158_s6, %s1159_s7  }
  0x1b   : > { %s1043_s10 = scalar_lea.vmem %s187_s29, 2048  ;;  %p1051_p10 = scmp.lt.s32.totalorder %s187_s29, %s187_s29 }
  0x1c   : > { %p1044_p3 = scmp.ne.s32.totalorder %s187_s29, %s1043_s10  ;;  %p1052_p1 = scmp.lt.s32.totalorder %s1043_s10, %s1043_s10 }
  0x1e   : > { %p1046_p6 = pnand %p1044_p3, %p1008_p8  ;;  %p1053_p12 = por %p1052_p1, %p1051_p10 }
  0x20   : > { %p1047_p9 = pneg %p1046_p6 }
  0x22   : > { %p1054_p11 = pnand %p1053_p12, %p1047_p9 }
  0x24   : > { %1057 = shalt.err (!%p1054_p11)
}
  0x25   : > { %s1160_s11 = smov 64   ;;  %s1161_s12 = smov 4  }
  0x26   : > { %911 = dma.hbm_to_vmem [thread:$0]  (!%p1236_p7), %s1342_s2, 2048, %s187_s29, [#allocation5], %s1160_s11, %s1160_s11, %s1161_s12  }
  0x27   : > { %s1162_s15 = smov [#allocation7]   ;;  %s1259_s17 = sadd.s32 1, %s1154_s21  }
  0x28   : > { %s199_s16 = sshll.u32 %s1162_s15, 4  ;;  %s200_s16 = int_to_ptr.vmem [resolvable:$true] %s199_s16 }
  0x29   : > { %s1069_s18 = scalar_lea.vmem %s200_s16, 1024  ;;  %p1077_p2 = scmp.lt.s32.totalorder %s200_s16, %s200_s16 }
  0x2a   : > { %p1070_p13 = scmp.ne.s32.totalorder %s200_s16, %s1069_s18  ;;  %p1078_p3 = scmp.lt.s32.totalorder %s1069_s18, %s1069_s18 }
  0x2c   : > { %p1072_p1 = pnand %p1070_p13, %p1008_p8  ;;  %p1079_p6 = por %p1078_p3, %p1077_p2 }
  0x2e   : > { %p1073_p0 = pneg %p1072_p1 }
  0x30   : > { %p1080_p9 = pnand %p1079_p6, %p1073_p0 }
  0x32   : > { %1083 = shalt.err (!%p1080_p9)
}
  0x33   : > { %914 = dma.hbm_to_vmem [thread:$0]  (!%p1236_p7), %s1343_s3, 1024, %s200_s16, [#allocation8], %s1160_s11, %s1160_s11, %s1161_s12  }
  0x34   : > { %s24_s28 = ssub.s32 %s1154_s21, %s1259_s17  ;;  %s27_s29 = sadd.s32 1, %s1150_s20 }
  0x35   : > { %p25_p8 = scmp.eq.s32.totalorder %s24_s28, 0  ;;  %p34_p10 = scmp.ne.s32.totalorder %s1150_s20, %s1146_s19 }
  0x36   : > { %p35_p12 = scmp.eq.s32.totalorder %s1154_s21, 0  ;;  %p922_p11 = scmp.lt.s32.totalorder %s1154_s21, 4 }
  0x37   : > { %s1277_s27 = scalar_select %p25_p8, %s1150_s20, %s27_s29  }
  0x38   : > { %p36_p13 = por %p35_p12, %p34_p10  ;;  %s216_s30 = sand.u32 1, %s1150_s20  }
  0x39   : > { %s800_s6 = sshll.u32 %s216_s30, 3  ;;  %s801_s7 = sshll.u32 %s1154_s21, 7 }
  0x3a   : > { %s1284_s10 = scalar_lea.hbm %s1340_s0, %s801_s7  ;;  %s220_s11 = scalar_lea.vmem [#allocation2], %s800_s6 }
  0x3b   : > { %s227_s12 = sshll.u32 %s220_s11, 4  ;;  %p1286_p7 = pnand %p922_p11, %p36_p13  ;;  %s228_s12 = int_to_ptr.vmem [resolvable:$true] %s227_s12 }
  0x3c   : > { %s217_s14 = scalar_lea.sflag [#allocation3], %s216_s30  ;;  %s1084_s15 = scalar_lea.hbm %s1284_s10, 128 }
  0x3d   : > { %p1085_p1 = scmp.ne.s32.totalorder %s1284_s10, %s1084_s15  ;;  %p1086_p0 = pneg %p1286_p7 }
  0x3e   : > { %s1089_s18 = scalar_lea.hbm %s1340_s0, 512  ;;  %p1090_p6 = scmp.lt.s32.totalorder %s1284_s10, %s1340_s0 }
  0x3f   : > { %p1087_p2 = pnand %p1086_p0, %p1085_p1  ;;  %p1091_p9 = scmp.lt.s32.totalorder %s1089_s18, %s1084_s15 }
  0x41   : > { %p1088_p3 = pneg %p1087_p2  ;;  %p1092_p8 = por %p1091_p9, %p1090_p6 }
  0x43   : > { %p1093_p10 = pnand %p1092_p8, %p1088_p3 }
  0x45   : > { %1096 = shalt.err (!%p1093_p10)
}
  0x46   : > { %s1097_s28 = scalar_lea.vmem %s228_s12, 128  ;;  %s1163_s29 = smov [#allocation2]  }
  0x47   : > { %p1098_p12 = scmp.ne.s32.totalorder %s228_s12, %s1097_s28  ;;  %s1102_s30 = sshll.u32 %s1163_s29, 4  ;;  %s1103_s30 = int_to_ptr.vmem [resolvable:$false] %s1102_s30 }
  0x48   : > { %s1104_s6 = scalar_lea.vmem %s1103_s30, 256  ;;  %p1105_p1 = scmp.lt.s32.totalorder %s228_s12, %s1103_s30 }
  0x49   : > { %p1100_p11 = pnand %p1098_p12, %p1086_p0  ;;  %p1106_p2 = scmp.lt.s32.totalorder %s1104_s6, %s1097_s28 }
  0x4b   : > { %p1101_p13 = pneg %p1100_p11  ;;  %p1107_p4 = por %p1106_p2, %p1105_p1 }
  0x4d   : > { %p1108_p5 = pnand %p1107_p4, %p1101_p13 }
  0x4f   : > { %1111 = shalt.err (!%p1108_p5)
}
  0x50   : > { %918 = dma.hbm_to_vmem [thread:$0]  (!%p1286_p7), %s1284_s10, 128, %s228_s12, %s217_s14  }
  0x51   : > { %p1353_p3 = scmp.ne.s32.totalorder %s1350_s24, 0 }
  0x52   : > { %s238_s7 = sand.u32 (!%p1353_p3), 1, %s1146_s19   ;;  %p1354_p0 = scmp.ne.s32.totalorder (!%p1353_p3), %s1349_s23, 0 }
  0x53   : > { %236 = sbr.rel (%p1353_p3) target bundleno = 815 (0x32f), region = 40  ;;  %s803_s8 = sshll.u32 (!%p1353_p3), %s238_s7, 3 }
  0x54   : > { %s239_s9 = scalar_lea.sflag (!%p1353_p3), [#allocation3], %s238_s7  ;;  %s242_s11 = scalar_lea.vmem (!%p1353_p3), [#allocation2], %s803_s8 }
  0x58   : > { %1129 = dma.done.wait (%p1354_p0), %s239_s9, 128  }
  0x59   : > { %1131 = vsyncadd (%p1354_p0), %s239_s9, 4294967168  ;;  %p1355_p4 = scmp.eq.s32.totalorder %s1216_s22, 0 }
  0x5b   : > { %1133 = dma.done.wait (%p1355_p4), [#allocation5], 2560   ;;  %p1356_p5 = pmov %p1355_p4 }
  0x5c   : > { %p1357_p7 = pmov %p1355_p4 }
  0x5d   : > { %1135 = vsyncadd (%p1356_p5), [#allocation5], 4294964736 }
  0x5e   : > { %1137 = dma.done.wait (%p1357_p7), [#allocation8], 1024   ;;  %p1358_p6 = pmov %p1355_p4 }
  0x5f   : > { %v1164_v0 = vmov 0   ;;  %v968_v1 = vld [vmem:[#allocation4 + $0x14] ss:$8 sps:$4 sm:$0xff]   ;;  %v970_v2 = vld [vmem:[#allocation4 + $0x10] ss:$8 sps:$4 sm:$0xff]   ;;  %vm311_vm0 = vcmask 261120  }
  0x60   : > { %1139 = vsyncadd (%p1358_p6), [#allocation8], 4294966272  ;;  %347 = vmatprep.mubr.bf16.mxu0 %v1164_v0  ;;  %327 = vmatprep.subr.bf16.mxu0 %v968_v1  ;;  %v971_v3 = vld [vmem:[#allocation4 + $0x4] ss:$8 sps:$4 sm:$0xff]   ;;  %v973_v4 = vld [vmem:[#allocation4] ss:$8 sps:$4 sm:$0xff]  }
  0x61   : > { %v285_v5 = vld [vmem:[%s242_s11] sm:$0xff]  ;;  %328 = vmatpush1.bf16.msra.mxu0 %v970_v2  ;;  %v978_v11 = vld [vmem:[#allocation6 + $0x68] sm:$0xff]   ;;  %v980_v13 = vld [vmem:[#allocation6 + $0x60] sm:$0xff]   ;;  %vm1166_vm1 = vmmov 0   ;;  %p280_p9 = scmp.lt.s32.totalorder %s1216_s22, 3 }
  0x62   : > { %329 = vmatprep.subr.bf16.mxu0 %v971_v3  ;;  %v286_v6 = vpack.c.bf16 %v285_v5, %v285_v5  ;;  %v974_v7 = vld [vmem:[#allocation6 + $0x78] sm:$0xff]   ;;  %v976_v9 = vld [vmem:[#allocation6 + $0x70] sm:$0xff]   ;;  %v979_v12 = vld [vmem:[#allocation6 + $0x28] sm:$0xff]  }
  0x63   : > { %v975_v8 = vld [vmem:[#allocation6 + $0x38] sm:$0xff]   ;;  %840 = vmatprep.subr.bf16.mxu1 %v974_v7  ;;  %v977_v10 = vld [vmem:[#allocation6 + $0x30] sm:$0xff]   ;;  %v981_v14 = vld [vmem:[#allocation6 + $0x20] sm:$0xff]   ;;  %s1364_s22 = smov (!%p280_p9, %s1216_s22), 3 }
  0x64   : > { %841 = vmatpush3.bf16.msra.mxu1 %v975_v8  ;;  %v982_v15 = vld [vmem:[#allocation6 + $0x58] sm:$0xff]   ;;  %v984_v17 = vld [vmem:[#allocation6 + $0x50] sm:$0xff]   ;;  %v986_v19 = vld [vmem:[#allocation6 + $0x48] sm:$0xff]   ;;  %s807_s10 = sshll.u32 %s1364_s22, 3 }
  0x65   : > { %330 = vmatpush1.bf16.msra.mxu0 %v973_v4  ;;  %842 = vmatprep.subr.bf16.mxu1 %v976_v9  ;;  %v983_v16 = vld [vmem:[#allocation6 + $0x18] sm:$0xff]   ;;  %v985_v18 = vld [vmem:[#allocation6 + $0x10] sm:$0xff]   ;;  %v987_v20 = vld [vmem:[#allocation6 + $0x8] sm:$0xff]   ;;  %s283_s14 = scalar_lea.vmem %s1345_s5, %s807_s10 }
  0x66   : > { %v988_v21 = vld [vmem:[#allocation6 + $0x40] sm:$0xff]   ;;  %v990_v5 = vld [vmem:[#allocation7 + $0x38] sm:$0xff]   ;;  %v991_v7 = vld [vmem:[#allocation7 + $0x30] sm:$0xff]  }
  0x67   : > { %v989_v22 = vld [vmem:[#allocation6] sm:$0xff]   ;;  %v992_v8 = vld [vmem:[#allocation7 + $0x28] sm:$0xff]  }
  0x68   : > { %812 = vmatmul.mubr.msk.bf16.vlgmr.msra.gmra.mxu0 %vm311_vm0, %v286_v6  ;;  %843 = vmatpush3.bf16.msra.mxu1 %v977_v10  ;;  %v1165_v6 = vmov 0.0   ;;  %v993_v9 = vld [vmem:[#allocation7 + $0x20] sm:$0xff]   ;;  %v994_v10 = vld [vmem:[#allocation7 + $0x18] sm:$0xff]  }
  0x69   : > { %844 = vmatprep.subr.bf16.mxu1 %v978_v11  ;;  %871 = vmatprep.subr.bf16.mxu0 %v1165_v6  ;;  %v995_v11 = vld [vmem:[#allocation7 + $0x10] sm:$0xff]  }
  0x6a   : > { %872 = vmatpush3.bf16.msra.mxu0 %v990_v5  ;;  %887 = vmatprep.mubr.msk.bf16.mxu0 %vm1166_vm1, %v1165_v6 }
  0x6b   : > { %873 = vmatprep.subr.bf16.mxu0 %v1165_v6 }
  0x6c   : > { %845 = vmatpush3.bf16.msra.mxu1 %v979_v12  ;;  %v996_v12 = vld [vmem:[#allocation7 + $0x8] sm:$0xff]  }
  0x6d   : > { %846 = vmatprep.subr.bf16.mxu1 %v980_v13  ;;  %v997_v13 = vld [vmem:[#allocation7] sm:$0xff]  }
  0x6e   : > { %874 = vmatpush3.bf16.msra.mxu0 %v991_v7 }
  0x6f   : > { %875 = vmatprep.subr.bf16.mxu0 %v1165_v6 }
  0x70   : > { %847 = vmatpush3.bf16.msra.mxu1 %v981_v14 }
  0x71   : > { %848 = vmatprep.subr.bf16.mxu1 %v982_v15 }
  0x72   : > { %876 = vmatpush3.bf16.msra.mxu0 %v992_v8 }
  0x73   : > { %877 = vmatprep.subr.bf16.mxu0 %v1165_v6 }
  0x74   : > { %849 = vmatpush3.bf16.msra.mxu1 %v983_v16 }
  0x75   : > { %850 = vmatprep.subr.bf16.mxu1 %v984_v17 }
  0x76   : > { %878 = vmatpush3.bf16.msra.mxu0 %v993_v9 }
  0x77   : > { %879 = vmatprep.subr.bf16.mxu0 %v1165_v6 }
  0x78   : > { %851 = vmatpush3.bf16.msra.mxu1 %v985_v18 }
  0x79   : > { %852 = vmatprep.subr.bf16.mxu1 %v986_v19 }
  0x7a   : > { %880 = vmatpush3.bf16.msra.mxu0 %v994_v10 }
  0x7b   : > { %881 = vmatprep.subr.bf16.mxu0 %v1165_v6 }
  0x7c   : > { %853 = vmatpush3.bf16.msra.mxu1 %v987_v20 }
  0x7d   : > { %854 = vmatprep.subr.bf16.mxu1 %v988_v21 }
  0x7e   : > { %882 = vmatpush3.bf16.msra.mxu0 %v995_v11 }
  0x7f   : > { %883 = vmatprep.subr.bf16.mxu0 %v1165_v6 }
  0x80   : > { %855 = vmatpush3.bf16.msra.mxu1 %v989_v22 }
  0x82   : > { %884 = vmatpush3.bf16.msra.mxu0 %v996_v12 }
  0x83   : > { %885 = vmatprep.subr.bf16.mxu0 %v1165_v6 }
  0x86   : > { %886 = vmatpush3.bf16.msra.mxu0 %v997_v13 }
 0x128   : > { %v349_v23 = vpop.f32.mrf.mxu0 }
 0x129   : > { %v356_v24 = vrot.slane %v349_v23, 4 }
 0x12a   : > { %v351_v25 = vpop.f32.mrf.mxu0 }
 0x12b   : > { %v357_v26 = vadd.f32 %v356_v24, %v349_v23  ;;  %v362_v27 = vrot.slane %v351_v25, 4 }
 0x12c   : > { %v353_v28 = vpop.f32.mrf.mxu0 }
 0x12d   : > { %v358_v29 = vrot.slane %v357_v26, 2  ;;  %v363_v30 = vadd.f32 %v362_v27, %v351_v25 }
 0x12e   : > { %v354_v31 = vpop.f32.mrf.mxu0 }
 0x12f   : > { %v359_v32 = vadd.f32 %v358_v29, %v357_v26  ;;  %v364_v33 = vrot.slane %v363_v30, 2 }
 0x131   : > { %v360_v34 = vrot.slane %v359_v32, 1  ;;  %v365_v35 = vadd.f32 %v364_v33, %v363_v30 }
 0x133   : > { %v361_v36 = vadd.f32 %v360_v34, %v359_v32  ;;  %v366_v37 = vrot.slane %v365_v35, 1 }
 0x135   : > { %v368_v38 = vmul.f32 0.125, %v361_v36  ;;  %v367_v39 = vadd.f32 %v366_v37, %v365_v35 }
 0x137   : > { %v370_v40 = vsub.f32 %v349_v23, %v368_v38  ;;  %v369_v41 = vmul.f32 0.125, %v367_v39 }
 0x139   : > { %v372_v42 = vmul.f32 %v370_v40, %v370_v40  ;;  %v371_v43 = vsub.f32 %v351_v25, %v369_v41 }
 0x13b   : > { %v374_v44 = vrot.slane %v372_v42, 4  ;;  %v373_v45 = vmul.f32 %v371_v43, %v371_v43 }
 0x13d   : > { %v375_v46 = vadd.f32 %v374_v44, %v372_v42  ;;  %v380_v47 = vrot.slane %v373_v45, 4 }
 0x13f   : > { %v376_v48 = vrot.slane %v375_v46, 2  ;;  %v381_v49 = vadd.f32 %v380_v47, %v373_v45 }
 0x141   : > { %v377_v50 = vadd.f32 %v376_v48, %v375_v46  ;;  %v382_v51 = vrot.slane %v381_v49, 2 }
 0x143   : > { %v378_v52 = vrot.slane %v377_v50, 1  ;;  %v383_v53 = vadd.f32 %v382_v51, %v381_v49 }
 0x145   : > { %v379_v54 = vadd.f32 %v378_v52, %v377_v50  ;;  %v384_v55 = vrot.slane %v383_v53, 1 }
 0x147   : > { %v386_v56 = vmul.f32 0.125, %v379_v54  ;;  %v385_v57 = vadd.f32 %v384_v55, %v383_v53 }
 0x149   : > { %v388_v58 = vadd.f32 1e-05, %v386_v56  ;;  %v387_v59 = vmul.f32 0.125, %v385_v57 }
 0x14b   : > { %998 = vrsqrt.f32 %v388_v58  ;;  %v389_v60 = vadd.f32 1e-05, %v387_v59 }
 0x14d   : > { %1000 = vrsqrt.f32 %v389_v60 }
 0x158   : > { %v999_v61 = vpop.eup %998 }
 0x159   : > { %v392_v62 = vmul.f32 %v999_v61, %v370_v40  ;;  %v829_v40 = vld [vmem:[%s1344_s4] ss:$0 sm:$0xff] }
 0x15a   : > { %v1001_v63 = vpop.eup %1000 }
 0x15b   : > { %v393_v0 = vmul.f32 %v1001_v63, %v371_v43  ;;  %v394_v1 = vmax.f32 %v392_v62, 0.0 }
 0x15d   : > { %v395_v2 = vmax.f32 %v393_v0, 0.0  ;;  %v396_v4 = vpack.c.bf16 %v394_v1, %v394_v1 }
 0x15f   : > { %v397_v3 = vpack.c.bf16 %v395_v2, %v395_v2 }
 0x161   : > { %558 = vmatprep.mubr.bf16.mxu1 %v397_v3 }
 0x162   : > { %559 = vmatmul.mubr.bf16.vlgmr.msra.gmra.mxu1 %v396_v4 }
 0x222   : > { %v856_v14 = vpop.f32.mrf.mxu1 }
 0x224   : > { %v857_v15 = vpop.f32.mrf.mxu1 }
 0x225   : > { %v858_v16 = vadd.f32 %v857_v15, %v856_v14 }
 0x226   : > { %v859_v17 = vpop.f32.mrf.mxu1 }
 0x227   : > { %v566_v18 = vrot.slane %v858_v16, 4 }
 0x228   : > { %v860_v19 = vpop.f32.mrf.mxu1 }
 0x229   : > { %v567_v20 = vadd.f32 %v858_v16, %v566_v18 }
 0x22b   : > { %v568_v21 = vrot.slane %v567_v20, 2 }
 0x22d   : > { %v569_v22 = vadd.f32 %v568_v21, %v567_v20 }
 0x22f   : > { %v570_v23 = vrot.slane %v569_v22, 1 }
 0x231   : > { %v571_v24 = vadd.f32 %v570_v23, %v569_v22 }
 0x233   : > { %v572_v25 = vmul.f32 0.125, %v571_v24 }
 0x235   : > { %v573_v26 = vsub.f32 %v858_v16, %v572_v25 }
 0x237   : > { %v574_v27 = vmul.f32 %v573_v26, %v573_v26 }
 0x239   : > { %v575_v28 = vrot.slane %v574_v27, 4 }
 0x23b   : > { %v576_v29 = vadd.f32 %v575_v28, %v574_v27 }
 0x23d   : > { %v577_v30 = vrot.slane %v576_v29, 2 }
 0x23f   : > { %v578_v31 = vadd.f32 %v577_v30, %v576_v29 }
 0x241   : > { %v579_v32 = vrot.slane %v578_v31, 1 }
 0x243   : > { %v580_v33 = vadd.f32 %v579_v32, %v578_v31 }
 0x245   : > { %v581_v34 = vmul.f32 0.125, %v580_v33 }
 0x247   : > { %v582_v35 = vadd.f32 1e-05, %v581_v34 }
 0x249   : > { %1002 = vrsqrt.f32 %v582_v35 }
 0x256   : > { %v1003_v36 = vpop.eup %1002 }
 0x257   : > { %v584_v37 = vmul.f32 %v1003_v36, %v573_v26 }
 0x259   : > { %v585_v38 = vmax.f32 %v584_v37, 0.0 }
 0x25b   : > { %v586_v39 = vpack.c.bf16 %v585_v38, %v585_v38 }
 0x25d   : > { %888 = vmatmul.mubr.bf16.vlgmr.msra.gmra.mxu0 %v586_v39 }
 0x31d   : > { %v692_v41 = vpop.f32.mrf.mxu0 }
 0x31e   : > { %v693_v42 = vadd.f32 %v829_v40, %v692_v41 }
 0x31f   : > { %v889_v43 = vpop.f32.mrf.mxu0 }
 0x320   : > { %1004 = vtanh.f32 %v693_v42 }
 0x321   : > { %v695_v44 = vpop.f32.mrf.mxu0 }
 0x323   : > { %v890_v45 = vpop.f32.mrf.mxu0 }
 0x32d   : > { %v1005_v46 = vpop.eup %1004 }
 0x32e   : > { %699 = vst [vmem:[%s283_s14] sm:$0xff] %v1005_v46 }
 0x32f PF: > { %p17_p8 = scmp.ge.s32.totalorder %s1259_s17, 6   ;;  %s1359_s18 = smov %s1146_s19 }
 0x330   : > { %s1360_s19 = smov %s1150_s20  ;;  %s1361_s20 = smov %s1277_s27 }
 0x331   : > { %s1362_s21 = smov %s1259_s17  ;;  %19 = sbr.rel (!%p17_p8) target bundleno = 5 (0x5), region = 92 }
 0x336   :  { %719 = vsyncpa [#allocation3], 1 }
 0x337   :  { %721 = vsyncpa [#allocation3 + $0x1], 1 }
 0x338   :  { %722 = vsyncpa [#allocation5], 1 }
 0x339   :  { %723 = vsyncpa [#allocation8], 1 }

</bundles_post_ra>
